<compile_context>
chip_gen: v7x
topology: tpu7x:2x2x1
jax: 0.10.0
libtpu: 0.0.40
codegen_flags: <defaults>
</compile_context>

<pallas_src>
import jax
import jax.numpy as jnp
from jax.experimental import pallas as pl
from jax.experimental.pallas import tpu as pltpu


def _drop_path_kernel(mask_ref, x_ref, o_ref):
    # mask_ref: (tile_n, 1) f32; broadcasts over the lane (feature) axis.
    o_ref[...] = (x_ref[...].astype(jnp.float32) * mask_ref[...]).astype(o_ref.dtype)


def _round_up(v, m):
    return ((v + m - 1) // m) * m


def drop_path(x, *, prob=0.5, normalization=True, training=True, key=None,
              seed=0, donate=False):
    """JAX/Pallas equivalent of nnm.layers.drop.DropPath.forward."""
    if prob < 0.0 or prob > 1.0:
        raise ValueError(
            f"DropPath probability has to be between 0 and 1, but got {prob}")
    if prob == 0.0 or not training:
        return x
    if prob == 1.0:
        return jnp.zeros_like(x)  # matches the PyTorch spec's prob==1.0 branch

    if key is None:
        key = jax.random.PRNGKey(seed)

    keep_prob = 1.0 - prob
    orig_shape = x.shape
    n = orig_shape[0]
    f = 1
    for d in orig_shape[1:]:
        f *= d
    x2 = x.reshape(n, f)

    # Per-sample keep/scale vector, shape (N, 1), kept in f32 (the kernel
    # widens x to f32 for the multiply and narrows the product).
    keep = jax.random.bernoulli(key, keep_prob, (n, 1))
    scale = (1.0 / keep_prob) if normalization else 1.0
    mask = keep.astype(jnp.float32) * jnp.float32(scale)

    # ---- Tile selection ----------------------------------------------------
    dtype_bytes = jnp.dtype(x.dtype).itemsize
    # Sub-32-bit dtypes pack rows along sublanes: round N tiles accordingly.
    sublane = {4: 8, 2: 16, 1: 32}.get(dtype_bytes, 8)

    # Generation-aware block budget / VMEM cap.
    try:
        vmem_phys = pltpu.get_tpu_info().vmem_capacity_bytes
    except Exception:  # not a TPU / API unavailable: assume smallest (v7x) VMEM
        vmem_phys = 64 << 20
    if vmem_phys >= (96 << 20):          # v5e / v6e: 128 MiB physical VMEM
        target_bytes = 16 << 20
        vmem_cap = 96 << 20
    else:                                # v7x: 64 MiB physical VMEM
        target_bytes = 8 << 20
        vmem_cap = 40 << 20

    target_elems = max(128 * sublane, target_bytes // dtype_bytes)

    f_ceil = _round_up(f, 128)           # lane-aligned cover of F
    n_ceil = _round_up(n, sublane)       # sublane-aligned cover of N

    # F-first: maximize the lane-contiguous axis (long DMA segments, unmasked
    # lane-dense stores), then spend the remaining budget on N.
    tile_f = min(f_ceil, max(128, ((target_elems // sublane) // 128) * 128))
    tile_n = min(n_ceil,
                 max(sublane, ((target_elems // tile_f) // sublane) * sublane))

    grid_n = pl.cdiv(n, tile_n)
    grid_f = pl.cdiv(f, tile_f)

    # v7x megacore: ensure at least two programs along a parallel axis so both
    # TensorCores (and their DMA engines) get work.  Prefer splitting F (keeps
    # segments long); fall back to N.
    if grid_n * grid_f == 1:
        if f_ceil >= 256:
            tile_f = (((f_ceil // 128) + 1) // 2) * 128
        elif n_ceil >= 2 * sublane:
            tile_n = (((n_ceil // sublane) + 1) // 2) * sublane
        grid_n = pl.cdiv(n, tile_n)
        grid_f = pl.cdiv(f, tile_f)

    grid = (grid_n, grid_f)              # F innermost: mask DMA reissue elided

    # Double-buffered in + out blocks + tiny mask + slack, clamped to a
    # generation-safe cap (well under physical VMEM).
    block_bytes = tile_n * tile_f * dtype_bytes
    vmem_limit = min(
        max(4 * block_bytes + 2 * tile_n * 4 + (2 << 20), 16 << 20),
        vmem_cap)

    cost = pl.CostEstimate(
        flops=n * f,
        transcendentals=0,
        bytes_accessed=2 * n * f * dtype_bytes + n * 4)

    out = pl.pallas_call(
        _drop_path_kernel,
        out_shape=jax.ShapeDtypeStruct((n, f), x.dtype),
        grid_spec=pltpu.PrefetchScalarGridSpec(
            num_scalar_prefetch=0,
            grid=grid,
            in_specs=[
                pl.BlockSpec((tile_n, 1), lambda i, j: (i, 0)),        # mask
                pl.BlockSpec((tile_n, tile_f), lambda i, j: (i, j)),   # x
            ],
            out_specs=pl.BlockSpec((tile_n, tile_f), lambda i, j: (i, j)),
        ),
        compiler_params=pltpu.CompilerParams(
            dimension_semantics=("parallel", "parallel"),
            vmem_limit_bytes=vmem_limit),
        cost_estimate=cost,
        # Only avoids an extra HBM buffer if the caller actually donates x
        # into the enclosing jit; otherwise XLA inserts a defensive copy.
        input_output_aliases=({1: 0} if donate else {}),
    )(mask, x2)

    return out.reshape(orig_shape)


if __name__ == "__main__":
    root = jax.random.PRNGKey(0)
    kx, kmask = jax.random.split(root)
    x = jax.random.normal(kx, (2, 4, 16, 16), dtype=jnp.float32)   # NCHW

    prob = 0.5
    keep_prob = 1.0 - prob
    y = drop_path(x, prob=prob, normalization=True, training=True, key=kmask)
    y = jax.block_until_ready(y)
    assert y.shape == x.shape and y.dtype == x.dtype

    # Exact reference: same key -> same Bernoulli draws as the wrapper.
    keep = jax.random.bernoulli(kmask, keep_prob, (x.shape[0], 1))
    ref = x * (keep.astype(jnp.float32) / keep_prob).reshape(x.shape[0], 1, 1, 1)
    assert bool(jnp.allclose(y, ref)), "kernel output mismatch vs reference"

    # Every sample's output is either all-zeros or input / keep_prob.
    yr = y.reshape(x.shape[0], -1)
    xr = (x / keep_prob).reshape(x.shape[0], -1)
    per_sample_zero = jnp.all(yr == 0, axis=1)
    per_sample_scaled = jnp.all(jnp.isclose(yr, xr), axis=1)
    assert bool(jnp.all(per_sample_zero | per_sample_scaled))

    # Wrapper fast paths: eval mode / prob==0 identity, prob==1 zeros.
    y_eval = jax.block_until_ready(drop_path(x, prob=0.5, training=False))
    assert bool(jnp.all(y_eval == x))
    y_one = jax.block_until_ready(drop_path(x, prob=1.0, training=True))
    assert bool(jnp.all(y_one == 0))

    # Non-128-aligned feature count exercises the masked partial last block
    # (no pad/slice HBM copies).
    x_odd = jax.random.normal(kx, (2, 3, 5, 7), dtype=jnp.float32)   # F = 105
    y_odd = jax.block_until_ready(
        drop_path(x_odd, prob=0.3, normalization=False, training=True,
                  key=kmask))
    keep_odd = jax.random.bernoulli(kmask, 0.7, (2, 1))
    ref_odd = x_odd * keep_odd.astype(jnp.float32).reshape(2, 1, 1, 1)
    assert bool(jnp.allclose(y_odd, ref_odd))

    # bf16 path: f32 mask, widened multiply, narrowed product.
    x_bf = x.astype(jnp.bfloat16)
    y_bf = jax.block_until_ready(
        drop_path(x_bf, prob=prob, normalization=True, training=True, key=kmask))
    ref_bf = (x_bf.astype(jnp.float32)
              * (keep.astype(jnp.float32) / keep_prob).reshape(2, 1, 1, 1)
              ).astype(jnp.bfloat16)
    assert y_bf.dtype == jnp.bfloat16 and bool(jnp.all(y_bf == ref_bf))

    print("KERNEL_OK")
</pallas_src>

<mosaic_0001>
module attributes {stable_mosaic.version = 11 : i64} {
  func.func @_drop_path_kernel(%arg0: i32, %arg1: i32, %arg2: memref<8x1xf32, #tpu.memory_space<vmem>>, %arg3: memref<8x512xf32, #tpu.memory_space<vmem>>, %arg4: memref<8x512xf32, #tpu.memory_space<vmem>>) attributes {dimension_semantics = [#tpu.dimension_semantics<parallel>, #tpu.dimension_semantics<parallel>], iteration_bounds = array<i64: 1, 2>, scalar_prefetch = 0 : i64, scratch_operands = 0 : i64, tpu.core_type = #tpu.core_type<tc>, window_params = [{transform_indices = @transform_0, window_bounds = array<i64: 8, 1>}, {transform_indices = @transform_1, window_bounds = array<i64: 8, 512>}, {transform_indices = @transform_2, window_bounds = array<i64: 8, 512>}]} {
    %c0 = arith.constant 0 : index
    %c0_0 = arith.constant 0 : index
    %0 = vector.load %arg3[%c0, %c0_0] : memref<8x512xf32, #tpu.memory_space<vmem>>, vector<8x512xf32>
    %c0_1 = arith.constant 0 : index
    %c0_2 = arith.constant 0 : index
    %1 = vector.load %arg2[%c0_1, %c0_2] : memref<8x1xf32, #tpu.memory_space<vmem>>, vector<8x1xf32>
    %2 = vector.broadcast %1 : vector<8x1xf32> to vector<8x512xf32>
    %3 = arith.mulf %0, %2 : vector<8x512xf32>
    %c0_3 = arith.constant 0 : index
    %c0_4 = arith.constant 0 : index
    %4 = vector.load %arg4[%c0_3, %c0_4] : memref<8x512xf32, #tpu.memory_space<vmem>>, vector<8x512xf32>
    tpu.vector_store %arg4[%c0_3, %c0_4], %3 {strides = array<i32>} : memref<8x512xf32, #tpu.memory_space<vmem>>, vector<8x512xf32>,
    return
  }
  func.func @transform_0(%arg0: i32, %arg1: i32) -> (i32, i32) {
    %c0_i32 = arith.constant 0 : i32
    %c0_i32_0 = arith.constant 0 : i32
    return %arg0, %c0_i32 : i32, i32
  }
  func.func @transform_1(%arg0: i32, %arg1: i32) -> (i32, i32) {
    %c0_i32 = arith.constant 0 : i32
    return %arg0, %arg1 : i32, i32
  }
  func.func @transform_2(%arg0: i32, %arg1: i32) -> (i32, i32) {
    %c0_i32 = arith.constant 0 : i32
    return %arg0, %arg1 : i32, i32
  }
}

</mosaic_0001>

<bundles_post_ra>
// kernel: tpu_custom_call.1
= control target key start
LH: loop header
LB: loop body
LE: loop exit
PB: predicated region body
PF: predicated region fallthrough
CT: control target
= control target key end

     0   :  { %7 = vsyncpa [#allocation3], 0  ;;  %s778_s0 = inlined_call_operand.vmem [shape: f32[2,1], index: 0, kind: input, shape index: {}]   ;;  %s779_s1 = inlined_call_operand.hbm [shape: f32[2,1024], index: 1, kind: input, shape index: {}]   ;;  %s780_s2 = inlined_call_operand.hbm [shape: f32[2,1024], index: 2, kind: output, shape index: {}]  }
   0x1   :  { %9 = vsyncpa [#allocation3 + $0x1], 0 }
   0x2   :  { %10 = vsyncpa [#allocation4], 0 }
   0x3   :  { %12 = vsyncpa [#allocation4 + $0x1], 0  ;;  %s618_s9 = smov 0   ;;  %s620_s10 = smov 0  }
   0x4   :  { %s622_s11 = smov 0   ;;  %s624_s12 = smov 0  }
   0x5   :  { %s626_s13 = smov 0   ;;  %s628_s14 = smov 0  }
   0x6 LB: > { %s401_s15 = sadd.s32 4294967295, %s588_s14   ;;  %s402_s16 = sadd.s32 4294967294, %s588_s14   ;;  %s588_s14 = sphi %s628_s14, %s18_s14   ;;  %s584_s13 = sphi %s626_s13, %s791_s13   ;;  %s580_s12 = sphi %s624_s12, %s790_s12   ;;  %s576_s11 = sphi %s622_s11, %s789_s11   ;;  %s572_s10 = sphi %s620_s10, %s788_s10   ;;  %s568_s9 = sphi %s618_s9, %s787_s9  }
   0x7   : > { %s27_s17 = sadd.s32 1, %s584_s13  ;;  %s65_s18 = sadd.s32 1, %s576_s11 }
   0x8   : > { %p28_p0 = scmp.ge.s32.totalorder %s27_s17, 2  ;;  %p72_p1 = scmp.ne.s32.totalorder %s576_s11, %s572_s10 }
   0x9   : > { %p73_p2 = scmp.eq.s32.totalorder %s588_s14, 0  ;;  %p78_p3 = scmp.ne.s32.totalorder %s572_s10, %s568_s9 }
   0xa   : > { %s793_s17 = smov (%p28_p0, %s27_s17), 0  ;;  %p79_p5 = scmp.eq.s32.totalorder %s401_s15, 0 }
   0xb   : > { %p74_p4 = por %p73_p2, %p72_p1  ;;  %s61_s19 = ssub.s32 %s584_s13, %s793_s17 }
   0xc   : > { %p104_p6 = scmp.eq.s32.totalorder %s401_s15, 1  ;;  %p63_p7 = scmp.eq.s32.totalorder %s61_s19, 0 }
   0xd   : > { %p661_p8 = por %p79_p5, %p78_p3  ;;  %p110_p10 = scmp.eq.s32.totalorder %s402_s16, 1 }
   0xe   : > { %p665_p9 = por %p104_p6, %p72_p1  ;;  %p781_p12 = scmp.ge.s32.totalorder %s588_s14, 2 }
   0xf   : > { %s670_s22 = scalar_select %p63_p7, %s576_s11, %s65_s18  }
  0x10   : > { %p672_p11 = por %p110_p10, %p78_p3  ;;  %139 = sbr.rel (%p781_p12) target bundleno = 55 (0x37), region = 20 }
  0x12   : > { %s784_s23 = scalar_select %p672_p11, 1, 0 }
  0x17   : > { %142 = sbr.rel (!%p74_p4) target bundleno = 55 (0x37), region = 24  ;;  %s143_s24 = sand.u32 (%p74_p4), 1, %s576_s11  }
  0x18   : > { %s406_s25 = sshll.u32 (%p74_p4), %s143_s24, 5  ;;  %s680_s26 = scalar_lea.sflag (%p74_p4), [#allocation3], %s143_s24 }
  0x19   : > { %s147_s27 = scalar_lea.vmem (%p74_p4), [#allocation2], %s406_s25 }
  0x1e   : > { %155 = vsyncadd %s680_s26, 384  ;;  %s417_s28 = sshll.u32 %s584_s13, 7  ;;  %s162_s29 = sshll.u32 %s147_s27, 4  ;;  %s689_s29 = int_to_ptr.vmem [resolvable:$true] %s162_s29 }
  0x1f   : > { %s687_s4 = scalar_lea.hbm %s779_s1, %s417_s28  ;;  %s488_s8 = scalar_lea.hbm %s779_s1, 256 }
  0x20   : > { %s486_s5 = scalar_lea.hbm %s687_s4, 128  ;;  %p489_p0 = scmp.lt.u32.totalorder %s687_s4, %s779_s1 }
  0x21   : > { %p487_p13 = scmp.ne.s32.totalorder %s687_s4, %s486_s5  ;;  %p490_p1 = scmp.lt.u32.totalorder %s488_s8, %s486_s5 }
  0x22   : > { %p492_p3 = scmp.lt.u32.totalorder %s486_s5, %s687_s4 }
  0x23   : > { %p491_p2 = por %p490_p1, %p489_p0 }
  0x25   : > { %p493_p4 = por %p492_p3, %p491_p2 }
  0x27   : > { %p494_p5 = pnand %p493_p4, %p487_p13 }
  0x29   : > { %497 = shalt.err (!%p494_p5)
}
  0x2a   : > { %s498_s18 = scalar_lea.vmem %s689_s29, 128  ;;  %s590_s19 = smov [#allocation2]  }
  0x2b   : > { %p499_p6 = scmp.ne.s32.totalorder %s689_s29, %s498_s18  ;;  %s500_s24 = sshll.u32 %s590_s19, 4  ;;  %s501_s24 = int_to_ptr.vmem [resolvable:$false] %s500_s24 }
  0x2c   : > { %s502_s25 = scalar_lea.vmem %s501_s24, 1024  ;;  %p503_p7 = scmp.lt.s32.totalorder %s689_s29, %s501_s24 }
  0x2d   : > { %p504_p10 = scmp.lt.s32.totalorder %s502_s25, %s498_s18 }
  0x2f   : > { %p505_p12 = por %p504_p10, %p503_p7 }
  0x31   : > { %p506_p11 = pnand %p505_p12, %p499_p6 }
  0x33   : > { %509 = shalt.err (!%p506_p11)
}
  0x34   : > { %s591_s27 = smov 256   ;;  %s592_s28 = smov 128  }
  0x35   : > { %s593_s30 = smov 8  }
  0x36   : > { %168 = dma.hbm_to_vmem [thread:$0]  %s687_s4, 128, %s689_s29, %s680_s26, %s591_s27, %s592_s28, %s593_s30  }
  0x37 PF: > { %p409_p13 = scmp.ge.s32.totalorder %s588_s14, 1  ;;  %p170_p0 = scmp.lt.s32.totalorder %s588_s14, 3 }
  0x39   : > { %p171_p1 = pnand %p409_p13, %p170_p0 }
  0x3a   : > { %s710_s3 = sand.u32 (!%p171_p1), 1, %s572_s10  }
  0x3b   : > { %174 = sbr.rel (%p171_p1) target bundleno = 229 (0xe5), region = 28  ;;  %s410_s5 = sshll.u32 (!%p171_p1), %s710_s3, 5 }
  0x3c   : > { %s177_s6 = scalar_lea.sflag (!%p171_p1), [#allocation3], %s710_s3  ;;  %s180_s7 = scalar_lea.vmem (!%p171_p1), [#allocation2], %s410_s5 }
  0x42   : > { %559 = dma.done.wait (%p661_p8), %s177_s6, 512  }
  0x43   : > { %561 = vsyncadd (%p661_p8), %s177_s6, 4294966784  ;;  %v594_v0 = vmov 0   ;;  %v232_v1 = vld [vmem:[%s778_s0] sm:$0xff]  ;;  %v240_v2 = vlaneseq  ;;  %v595_v3 = vmov 269488144   ;;  %v229_v22 = vld [vmem:[%s180_s7 + $0x8] sm:$0xff] }
  0x44   : > { %485 = vset.pattern.permute.xlu0 %v594_v0  ;;  %v238_v4 = vunpack.c.l.s4 %v595_v3  ;;  %v596_v5 = vmov 842150450   ;;  %v597_v7 = vmov 1414812756   ;;  %v598_v9 = vmov 1987475062  }
  0x45   : > { %235 = vperm.xlu0 %485, %v232_v1   ;;  %v245_v6 = vunpack.c.l.s4 %v596_v5  ;;  %v252_v8 = vunpack.c.l.s4 %v597_v7  ;;  %v259_v10 = vunpack.c.l.s4 %v598_v9  ;;  %v241_v11 = vshrl.u32 %v240_v2, 7  ;;  %v228_v20 = vld [vmem:[%s180_s7] sm:$0xff]  ;;  %v230_v23 = vld [vmem:[%s180_s7 + $0x10] sm:$0xff]  ;;  %v231_v24 = vld [vmem:[%s180_s7 + $0x18] sm:$0xff]  ;;  %s207_s20 = scalar_lea.vmem [#allocation5], %s410_s5  ;;  %s278_s4 = scalar_lea.sflag [#allocation4], %s710_s3 }
  0x46   : > { %v239_v12 = vunpack.c.0.s8 %v238_v4 }
  0x47   : > { %v246_v13 = vunpack.c.0.s8 %v245_v6  ;;  %v253_v14 = vunpack.c.0.s8 %v252_v8  ;;  %v260_v15 = vunpack.c.0.s8 %v259_v10 }
  0x48   : > { %v242_v16 = vsub.s32 %v239_v12, %v241_v11 }
  0x49   : > { %v249_v17 = vsub.s32 %v246_v13, %v241_v11  ;;  %v256_v18 = vsub.s32 %v253_v14, %v241_v11  ;;  %v263_v19 = vsub.s32 %v260_v15, %v241_v11 }
  0xc4   : > { %v236_v21 = vpop.permute.xlu0 %235  ;;  %284 = sbr.rel (!%p665_p9) target bundleno = 229 (0xe5), region = 36 }
  0xc5   : > { %v243_v25 = vrot.slane %v236_v21, %v242_v16  ;;  %v250_v26 = vrot.slane %v236_v21, %v249_v17  ;;  %v257_v27 = vrot.slane %v236_v21, %v256_v18  ;;  %v264_v28 = vrot.slane %v236_v21, %v263_v19 }
  0xc7   : > { %v269_v29 = vmul.f32 %v243_v25, %v228_v20  ;;  %v270_v30 = vmul.f32 %v250_v26, %v229_v22  ;;  %v271_v31 = vmul.f32 %v257_v27, %v230_v23  ;;  %v272_v32 = vmul.f32 %v264_v28, %v231_v24 }
  0xc9   : > { %273 = vst [vmem:[%s207_s20] sm:$0xff] %v269_v29  ;;  %274 = vst [vmem:[%s207_s20 + $0x8] sm:$0xff] %v270_v30 }
  0xca   : > { %275 = vst [vmem:[%s207_s20 + $0x10] sm:$0xff] %v271_v31  ;;  %276 = vst [vmem:[%s207_s20 + $0x18] sm:$0xff] %v272_v32 }
  0xcb   : > { %292 = vsyncadd %s278_s4, 384  ;;  %s418_s8 = sshll.u32 %s580_s12, 7  ;;  %s299_s15 = sshll.u32 %s207_s20, 4  ;;  %s736_s15 = int_to_ptr.vmem [resolvable:$true] %s299_s15 }
  0xcc   : > { %s734_s19 = scalar_lea.hbm %s780_s2, %s418_s8  ;;  %s510_s24 = scalar_lea.vmem %s736_s15, 128 }
  0xcd   : > { %p511_p8 = scmp.ne.s32.totalorder %s736_s15, %s510_s24  ;;  %s599_s21 = smov [#allocation5]  }
  0xce   : > { %s512_s25 = sshll.u32 %s599_s21, 4  ;;  %s513_s25 = int_to_ptr.vmem [resolvable:$false] %s512_s25 }
  0xcf   : > { %s514_s27 = scalar_lea.vmem %s513_s25, 1024  ;;  %p515_p9 = scmp.lt.s32.totalorder %s736_s15, %s513_s25 }
  0xd0   : > { %p516_p11 = scmp.lt.s32.totalorder %s514_s27, %s510_s24 }
  0xd2   : > { %p517_p12 = por %p516_p11, %p515_p9 }
  0xd4   : > { %p518_p2 = pnand %p517_p12, %p511_p8 }
  0xd6   : > { %521 = shalt.err (!%p518_p2)
}
  0xd7   : > { %s522_s12 = scalar_lea.hbm %s734_s19, 128  ;;  %s524_s5 = scalar_lea.hbm %s780_s2, 256 }
  0xd8   : > { %p523_p3 = scmp.ne.s32.totalorder %s734_s19, %s522_s12  ;;  %p525_p4 = scmp.lt.u32.totalorder %s734_s19, %s780_s2 }
  0xd9   : > { %p526_p5 = scmp.lt.u32.totalorder %s524_s5, %s522_s12  ;;  %p528_p7 = scmp.lt.u32.totalorder %s522_s12, %s734_s19 }
  0xdb   : > { %p527_p6 = por %p526_p5, %p525_p4 }
  0xdd   : > { %p529_p10 = por %p528_p7, %p527_p6 }
  0xdf   : > { %p530_p13 = pnand %p529_p10, %p523_p3 }
  0xe1   : > { %533 = shalt.err (!%p530_p13)
}
  0xe2   : > { %s600_s26 = smov 128   ;;  %s601_s29 = smov 256  }
  0xe3   : > { %s602_s20 = smov 8  }
  0xe4   : > { %305 = dma.vmem_to_hbm [thread:$0]  %s736_s15, 128, %s734_s19, %s278_s4, %s600_s26, %s601_s29, %s602_s20  }
  0xe5 PF: > { %s314_s8 = sand.u32 1, %s568_s9   ;;  %p785_p0 = scmp.ne.s32.totalorder %s784_s23, 0 }
  0xe6   : > { %p786_p1 = scmp.ge.s32.totalorder %s588_s14, 2  ;;  %s315_s16 = scalar_lea.sflag [#allocation4], %s314_s8 }
  0xe8   : > { %p422_p8 = pnand %p786_p1, %p785_p0 }
  0xea   : > { %563 = dma.done.wait (!%p422_p8), %s315_s16, 512  }
  0xeb   : > { %565 = vsyncadd (!%p422_p8), %s315_s16, 4294966784  ;;  %s18_s14 = sadd.s32 1, %s588_s14   ;;  %s787_s9 = smov %s572_s10 }
  0xec   : > { %p15_p9 = scmp.ge.s32.totalorder %s18_s14, 4   ;;  %s788_s10 = smov %s576_s11 }
  0xed   : > { %s789_s11 = smov %s670_s22  ;;  %s790_s12 = smov %s584_s13 }
  0xee   : > { %s791_s13 = smov %s793_s17  ;;  %17 = sbr.rel (!%p15_p9) target bundleno = 6 (0x6), region = 76 }
  0xf5   :  { %320 = vsyncpa [#allocation3], 1 }
  0xf6   :  { %322 = vsyncpa [#allocation3 + $0x1], 1 }
  0xf7   :  { %323 = vsyncpa [#allocation4], 1 }
  0xf8   :  { %325 = vsyncpa [#allocation4 + $0x1], 1 }

</bundles_post_ra>
